<compile_context>
chip_gen: v6e
topology: v6e:2x2x1
jax: 0.10.0
libtpu: 0.0.40
codegen_flags: <defaults>
</compile_context>

<pallas_src>
import functools

import jax
import jax.numpy as jnp
from jax import lax
from jax.experimental import pallas as pl
from jax.experimental.pallas import tpu as pltpu


def _round_up(x, m):
    return (x + m - 1) // m * m


def _mnr_kernel(x1_ref, x2_ref, out_ref, m_ref, l_ref, diag_ref, *,
                n_valid, padded):
    i = pl.program_id(0)            # row block (parallel)
    j = pl.program_id(1)            # col block (reduction axis)
    ncol = pl.num_programs(1)

    @pl.when(j == 0)
    def _init():
        m_ref[...] = jnp.full_like(m_ref, -jnp.inf)
        l_ref[...] = jnp.zeros_like(l_ref)

    # (tm, tn) score tile on the MXU: contract hidden dim of both operands,
    # native input dtype, f32 accumulation, no explicit transpose.
    s_raw = lax.dot_general(
        x1_ref[...], x2_ref[...],
        dimension_numbers=(((1,), (1,)), ((), ())),
        preferred_element_type=jnp.float32)
    tm, tn = s_raw.shape

    # The diagonal of the full score matrix lives entirely in the j == i tile
    # (row blocks and column blocks have identical size/offsets).  Padded rows
    # in that tile are zero-dot-zero = 0, so no extra masking is needed.
    @pl.when(j == i)
    def _diag():
        r_iota = lax.broadcasted_iota(jnp.int32, (tm, tn), 0)
        c_iota = lax.broadcasted_iota(jnp.int32, (tm, tn), 1)
        diag_ref[...] = jnp.sum(
            jnp.where(r_iota == c_iota, s_raw, 0.0), axis=1, keepdims=True)

    if padded:
        # Exclude padded columns from the row-wise logsumexp.
        col_ids = j * tn + lax.broadcasted_iota(jnp.int32, (1, tn), 1)
        s = jnp.where(col_ids < n_valid, s_raw, -jnp.inf)
    else:
        s = s_raw

    # Online (flash-style) logsumexp update.
    m_prev = m_ref[...]                                        # (tm, 1)
    m_new = jnp.maximum(m_prev, jnp.max(s, axis=1, keepdims=True))
    alpha = jnp.exp(m_prev - m_new)
    p = jnp.exp(s - m_new)
    l_ref[...] = alpha * l_ref[...] + jnp.sum(p, axis=1, keepdims=True)
    m_ref[...] = m_new

    @pl.when(j == ncol - 1)
    def _finalize():
        lse = m_ref[...] + jnp.log(l_ref[...])                 # (tm, 1)
        if padded:
            # Padded rows must not contribute to the logsumexp sum.
            row_ids = i * tm + lax.broadcasted_iota(jnp.int32, (tm, 1), 0)
            lse = jnp.where(row_ids < n_valid, lse, 0.0)
        partial = jnp.sum(lse) - jnp.sum(diag_ref[...])
        # Lane-dense (8, 128) partial-result tile (unmasked full-vreg store).
        out_ref[...] = jnp.full(out_ref.shape, partial, dtype=out_ref.dtype)


def multiple_negatives_ranking_loss(x1, x2, *, block_b=None):
    """x1, x2: [batch_size, hidden_size] -> scalar float32 loss."""
    assert x1.ndim == 2 and x1.shape == x2.shape
    B, D = x1.shape

    d_pad = _round_up(D, 128)
    itemsize = jnp.dtype(x1.dtype).itemsize
    if block_b is None:
        # Keep (2 input streams x 2 pipeline buffers) comfortably inside the
        # default scoped-VMEM limits on v5e / v6e / v7x.
        vmem_budget = 24 * 1024 * 1024
        max_bb = max(8, (vmem_budget // (4 * d_pad * itemsize)) // 8 * 8)
        block_b = min(256, _round_up(B, 8), max_bb)
    block_b = max(8, _round_up(block_b, 8))

    b_pad = _round_up(B, block_b)
    if (b_pad, d_pad) != (B, D):
        pad = ((0, b_pad - B), (0, d_pad - D))
        x1 = jnp.pad(x1, pad)
        x2 = jnp.pad(x2, pad)
    padded = b_pad != B

    n_rb = b_pad // block_b
    n_cb = b_pad // block_b

    kernel = functools.partial(_mnr_kernel, n_valid=B, padded=padded)

    out = pl.pallas_call(
        kernel,
        out_shape=jax.ShapeDtypeStruct((n_rb * 8, 128), jnp.float32),
        grid_spec=pltpu.PrefetchScalarGridSpec(
            num_scalar_prefetch=0,
            grid=(n_rb, n_cb),
            in_specs=[
                pl.BlockSpec((block_b, d_pad), lambda i, j: (i, 0)),  # x1 rows
                pl.BlockSpec((block_b, d_pad), lambda i, j: (j, 0)),  # x2 cols
            ],
            out_specs=pl.BlockSpec((8, 128), lambda i, j: (i, 0)),
            scratch_shapes=[
                pltpu.VMEM((block_b, 1), jnp.float32),   # running max m_i
                pltpu.VMEM((block_b, 1), jnp.float32),   # running sum l_i
                pltpu.VMEM((block_b, 1), jnp.float32),   # per-row diag values
            ],
        ),
        compiler_params=pltpu.CompilerParams(
            dimension_semantics=("parallel", "arbitrary")),
    )(x1, x2)

    # One scalar partial per row block; reduce the tiny vector here.
    partials = out.reshape(n_rb, 8, 128)[:, 0, 0]
    return jnp.sum(partials) / jnp.float32(B)


def _reference(x1, x2):
    scores = jnp.matmul(x1.astype(jnp.float32), x2.astype(jnp.float32).T)
    diag_mean = jnp.mean(jnp.diag(scores))
    mean_lse = jnp.mean(jax.scipy.special.logsumexp(scores, axis=1))
    return -diag_mean + mean_lse


if __name__ == "__main__":
    key = jax.random.PRNGKey(0)
    k1, k2 = jax.random.split(key)

    # Small aligned case matching the module's [batch, hidden] layout.
    batch, hidden = 8, 32
    r1 = jax.random.normal(k1, (batch, hidden), dtype=jnp.float32)
    r2 = jax.random.normal(k2, (batch, hidden), dtype=jnp.float32)
    loss = multiple_negatives_ranking_loss(r1, r2)
    jax.block_until_ready(loss)
    ref = _reference(r1, r2)
    assert jnp.allclose(loss, ref, rtol=1e-5, atol=1e-5), (loss, ref)

    # Ragged case exercising the pad/mask path (non-multiple of 8 / 128).
    k3, k4 = jax.random.split(k2)
    r3 = jax.random.normal(k3, (13, 50), dtype=jnp.float32)
    r4 = jax.random.normal(k4, (13, 50), dtype=jnp.float32)
    loss2 = multiple_negatives_ranking_loss(r3, r4)
    jax.block_until_ready(loss2)
    ref2 = _reference(r3, r4)
    assert jnp.allclose(loss2, ref2, rtol=1e-5, atol=1e-5), (loss2, ref2)

    print("KERNEL_OK")
</pallas_src>

<mosaic_0001>
module attributes {stable_mosaic.version = 11 : i64} {
  func.func @_mnr_kernel(%arg0: i32, %arg1: i32, %arg2: memref<8x128xf32, #tpu.memory_space<vmem>>, %arg3: memref<8x128xf32, #tpu.memory_space<vmem>>, %arg4: memref<8x128xf32, #tpu.memory_space<vmem>>, %arg5: memref<8x1xf32, #tpu.memory_space<vmem>>, %arg6: memref<8x1xf32, #tpu.memory_space<vmem>>, %arg7: memref<8x1xf32, #tpu.memory_space<vmem>>) attributes {dimension_semantics = [#tpu.dimension_semantics<parallel>, #tpu.dimension_semantics<arbitrary>], iteration_bounds = array<i64: 1, 1>, scalar_prefetch = 0 : i64, scratch_operands = 3 : i64, tpu.core_type = #tpu.core_type<tc>, window_params = [{transform_indices = @transform_0, window_bounds = array<i64: 8, 128>}, {transform_indices = @transform_1, window_bounds = array<i64: 8, 128>}, {transform_indices = @transform_2, window_bounds = array<i64: 8, 128>}]} {
    %c0_i32 = arith.constant 0 : i32
    %0 = arith.cmpi eq, %arg1, %c0_i32 : i32
    %1 = arith.extui %0 : i1 to i32
    %c0_i32_0 = arith.constant 0 : i32
    %2 = arith.cmpi ne, %1, %c0_i32_0 : i32
    scf.if %2 {
      %cst_17 = arith.constant 0xFF800000 : f32
      %28 = vector.broadcast %cst_17 : f32 to vector<8x1xf32>
      %c0_18 = arith.constant 0 : index
      %c0_19 = arith.constant 0 : index
      %29 = vector.load %arg5[%c0_18, %c0_19] : memref<8x1xf32, #tpu.memory_space<vmem>>, vector<8x1xf32>
      tpu.vector_store %arg5[%c0_18, %c0_19], %28 {strides = array<i32>} : memref<8x1xf32, #tpu.memory_space<vmem>>, vector<8x1xf32>,
      %cst_20 = arith.constant 0.000000e+00 : f32
      %30 = vector.broadcast %cst_20 : f32 to vector<8x1xf32>
      %c0_21 = arith.constant 0 : index
      %c0_22 = arith.constant 0 : index
      %31 = vector.load %arg6[%c0_21, %c0_22] : memref<8x1xf32, #tpu.memory_space<vmem>>, vector<8x1xf32>
      tpu.vector_store %arg6[%c0_21, %c0_22], %30 {strides = array<i32>} : memref<8x1xf32, #tpu.memory_space<vmem>>, vector<8x1xf32>,
    } else {
    }
    %c0 = arith.constant 0 : index
    %c0_1 = arith.constant 0 : index
    %3 = vector.load %arg2[%c0, %c0_1] : memref<8x128xf32, #tpu.memory_space<vmem>>, vector<8x128xf32>
    %c0_2 = arith.constant 0 : index
    %c0_3 = arith.constant 0 : index
    %4 = vector.load %arg3[%c0_2, %c0_3] : memref<8x128xf32, #tpu.memory_space<vmem>>, vector<8x128xf32>
    %cst = arith.constant dense<0.000000e+00> : vector<8x8xf32>
    %5 = tpu.matmul %3, %4, %cst {dimension_numbers = #tpu.dot_dimension_numbers<[1], [1], [0], [0], [0, 0, 1, 0], [], []>} : vector<8x128xf32>, vector<8x128xf32>, vector<8x8xf32> -> vector<8x8xf32>
    %6 = arith.cmpi eq, %arg1, %arg0 : i32
    %7 = arith.extui %6 : i1 to i32
    %c0_i32_4 = arith.constant 0 : i32
    %8 = arith.cmpi ne, %7, %c0_i32_4 : i32
    scf.if %8 {
      %28 = tpu.iota {dimensions = array<i32: 0>} : vector<8x8xi32>
      %29 = tpu.iota {dimensions = array<i32: 1>} : vector<8x8xi32>
      %30 = arith.cmpi eq, %28, %29 : vector<8x8xi32>
      %cst_17 = arith.constant 0.000000e+00 : f32
      %31 = vector.broadcast %cst_17 : f32 to vector<8x8xf32>
      %32 = arith.select %30, %5, %31 : vector<8x8xi1>, vector<8x8xf32>
      %cst_18 = arith.constant dense<0.000000e+00> : vector<8xf32>
      %33 = vector.multi_reduction <add>, %32, %cst_18 [1] : vector<8x8xf32> to vector<8xf32>
      %34 = vector.shape_cast %33 : vector<8xf32> to vector<8x1xf32>
      %c0_19 = arith.constant 0 : index
      %c0_20 = arith.constant 0 : index
      %35 = vector.load %arg7[%c0_19, %c0_20] : memref<8x1xf32, #tpu.memory_space<vmem>>, vector<8x1xf32>
      tpu.vector_store %arg7[%c0_19, %c0_20], %34 {strides = array<i32>} : memref<8x1xf32, #tpu.memory_space<vmem>>, vector<8x1xf32>,
    } else {
    }
    %c0_5 = arith.constant 0 : index
    %c0_6 = arith.constant 0 : index
    %9 = vector.load %arg5[%c0_5, %c0_6] : memref<8x1xf32, #tpu.memory_space<vmem>>, vector<8x1xf32>
    %cst_7 = arith.constant dense<0xFF800000> : vector<8xf32>
    %10 = vector.multi_reduction <maximumf>, %5, %cst_7 [1] : vector<8x8xf32> to vector<8xf32>
    %11 = vector.shape_cast %10 : vector<8xf32> to vector<8x1xf32>
    %12 = arith.maximumf %9, %11 : vector<8x1xf32>
    %13 = arith.subf %9, %12 : vector<8x1xf32>
    %14 = math.exp %13 : vector<8x1xf32>
    %15 = vector.broadcast %12 : vector<8x1xf32> to vector<8x8xf32>
    %16 = arith.subf %5, %15 : vector<8x8xf32>
    %17 = math.exp %16 : vector<8x8xf32>
    %c0_8 = arith.constant 0 : index
    %c0_9 = arith.constant 0 : index
    %18 = vector.load %arg6[%c0_8, %c0_9] : memref<8x1xf32, #tpu.memory_space<vmem>>, vector<8x1xf32>
    %19 = arith.mulf %14, %18 : vector<8x1xf32>
    %cst_10 = arith.constant dense<0.000000e+00> : vector<8xf32>
    %20 = vector.multi_reduction <add>, %17, %cst_10 [1] : vector<8x8xf32> to vector<8xf32>
    %21 = vector.shape_cast %20 : vector<8xf32> to vector<8x1xf32>
    %22 = arith.addf %19, %21 : vector<8x1xf32>
    %c0_11 = arith.constant 0 : index
    %c0_12 = arith.constant 0 : index
    %23 = vector.load %arg6[%c0_11, %c0_12] : memref<8x1xf32, #tpu.memory_space<vmem>>, vector<8x1xf32>
    tpu.vector_store %arg6[%c0_11, %c0_12], %22 {strides = array<i32>} : memref<8x1xf32, #tpu.memory_space<vmem>>, vector<8x1xf32>,
    %c0_13 = arith.constant 0 : index
    %c0_14 = arith.constant 0 : index
    %24 = vector.load %arg5[%c0_13, %c0_14] : memref<8x1xf32, #tpu.memory_space<vmem>>, vector<8x1xf32>
    tpu.vector_store %arg5[%c0_13, %c0_14], %12 {strides = array<i32>} : memref<8x1xf32, #tpu.memory_space<vmem>>, vector<8x1xf32>,
    %c0_i32_15 = arith.constant 0 : i32
    %25 = arith.cmpi eq, %arg1, %c0_i32_15 : i32
    %26 = arith.extui %25 : i1 to i32
    %c0_i32_16 = arith.constant 0 : i32
    %27 = arith.cmpi ne, %26, %c0_i32_16 : i32
    scf.if %27 {
      %c0_17 = arith.constant 0 : index
      %c0_18 = arith.constant 0 : index
      %28 = vector.load %arg5[%c0_17, %c0_18] : memref<8x1xf32, #tpu.memory_space<vmem>>, vector<8x1xf32>
      %c0_19 = arith.constant 0 : index
      %c0_20 = arith.constant 0 : index
      %29 = vector.load %arg6[%c0_19, %c0_20] : memref<8x1xf32, #tpu.memory_space<vmem>>, vector<8x1xf32>
      %30 = math.log %29 : vector<8x1xf32>
      %31 = arith.addf %28, %30 : vector<8x1xf32>
      %32 = vector.shape_cast %31 : vector<8x1xf32> to vector<1x8x1xf32>
      %cst_21 = arith.constant dense<0.000000e+00> : vector<1xf32>
      %33 = vector.multi_reduction <add>, %32, %cst_21 [1, 2] : vector<1x8x1xf32> to vector<1xf32>
      %34 = vector.shape_cast %33 : vector<1xf32> to vector<1x1x1xf32>
      %35 = vector.extract %34[0, 0, 0] : f32 from vector<1x1x1xf32>
      %c0_22 = arith.constant 0 : index
      %c0_23 = arith.constant 0 : index
      %36 = vector.load %arg7[%c0_22, %c0_23] : memref<8x1xf32, #tpu.memory_space<vmem>>, vector<8x1xf32>
      %37 = vector.shape_cast %36 : vector<8x1xf32> to vector<1x8x1xf32>
      %cst_24 = arith.constant dense<0.000000e+00> : vector<1xf32>
      %38 = vector.multi_reduction <add>, %37, %cst_24 [1, 2] : vector<1x8x1xf32> to vector<1xf32>
      %39 = vector.shape_cast %38 : vector<1xf32> to vector<1x1x1xf32>
      %40 = vector.extract %39[0, 0, 0] : f32 from vector<1x1x1xf32>
      %41 = arith.subf %35, %40 : f32
      %42 = vector.broadcast %41 : f32 to vector<8x128xf32>
      %c0_25 = arith.constant 0 : index
      %c0_26 = arith.constant 0 : index
      %43 = vector.load %arg4[%c0_25, %c0_26] : memref<8x128xf32, #tpu.memory_space<vmem>>, vector<8x128xf32>
      tpu.vector_store %arg4[%c0_25, %c0_26], %42 {strides = array<i32>} : memref<8x128xf32, #tpu.memory_space<vmem>>, vector<8x128xf32>,
    } else {
    }
    return
  }
  func.func @transform_0(%arg0: i32, %arg1: i32) -> (i32, i32) {
    %c0_i32 = arith.constant 0 : i32
    %c0_i32_0 = arith.constant 0 : i32
    return %arg0, %c0_i32 : i32, i32
  }
  func.func @transform_1(%arg0: i32, %arg1: i32) -> (i32, i32) {
    %c0_i32 = arith.constant 0 : i32
    %c0_i32_0 = arith.constant 0 : i32
    return %arg1, %c0_i32 : i32, i32
  }
  func.func @transform_2(%arg0: i32, %arg1: i32) -> (i32, i32) {
    %c0_i32 = arith.constant 0 : i32
    %c0_i32_0 = arith.constant 0 : i32
    return %arg0, %c0_i32 : i32, i32
  }
}

</mosaic_0001>

<bundles_post_ra>
// kernel: tpu_custom_call.1
= control target key start
LH: loop header
LB: loop body
LE: loop exit
PB: predicated region body
PF: predicated region fallthrough
CT: control target
= control target key end

     0   :  { %7 = vsyncpa [#allocation6], 0  ;;  %s337_s0 = inlined_call_operand.hbm [shape: f32[8,128], index: 0, kind: input, shape index: {}]   ;;  %s338_s1 = inlined_call_operand.hbm [shape: f32[8,128], index: 1, kind: input, shape index: {}]   ;;  %s339_s2 = inlined_call_operand.hbm [shape: f32[8,128], index: 2, kind: output, shape index: {}]  }
   0x1   :  { %8 = vsyncpa [#allocation9], 0 }
   0x2   :  { %9 = vsyncpa [#allocation7], 0  ;;  %s296_s9 = smov [#allocation5]   ;;  %s297_s11 = smov [#allocation8]  }
   0x3   :  { %s16_s10 = sshll.u32 %s296_s9, 4  ;;  %s26_s12 = sshll.u32 %s297_s11, 4  ;;  %s17_s10 = int_to_ptr.vmem [resolvable:$true] %s16_s10  ;;  %s27_s12 = int_to_ptr.vmem [resolvable:$true] %s26_s12 }
   0x4   :  { %s238_s13 = scalar_lea.vmem %s17_s10, 128  ;;  %p243_p1 = scmp.lt.s32.totalorder %s17_s10, %s17_s10 }
   0x5   :  { %p239_p0 = scmp.ne.s32.totalorder %s17_s10, %s238_s13  ;;  %p244_p2 = scmp.lt.s32.totalorder %s238_s13, %s238_s13 }
   0x7   :  { %p245_p3 = por %p244_p2, %p243_p1 }
   0x9   :  { %p246_p4 = pnand %p245_p3, %p239_p0 }
   0xb   :  { %249 = shalt.err (!%p246_p4)
}
   0xc   :  { %19 = dma.hbm_to_vmem [thread:$0]  %s337_s0, 128, %s17_s10, [#allocation6]  }
   0xd   :  { %s258_s16 = scalar_lea.vmem %s27_s12, 128  ;;  %p263_p6 = scmp.lt.s32.totalorder %s27_s12, %s27_s12 }
   0xe   :  { %p259_p5 = scmp.ne.s32.totalorder %s27_s12, %s258_s16  ;;  %p264_p7 = scmp.lt.s32.totalorder %s258_s16, %s258_s16 }
  0x10   :  { %p265_p8 = por %p264_p7, %p263_p6 }
  0x12   :  { %p266_p9 = pnand %p265_p8, %p259_p5 }
  0x14   :  { %269 = shalt.err (!%p266_p9)
}
  0x15   :  { %29 = dma.hbm_to_vmem [thread:$0]  %s338_s1, 128, %s27_s12, [#allocation9]  }
  0x16   :  { %290 = dma.done.wait [#allocation6], 128  }
  0x17   :  { %291 = vsyncadd [#allocation6], 4294967168 }
  0x18   :  { %292 = dma.done.wait [#allocation9], 128  }
  0x19   :  { %293 = vsyncadd [#allocation9], 4294967168  ;;  %vm40_vm0 = vcmask 7168   ;;  %v298_v0 = vmov 0.0   ;;  %vm299_vm1 = vmmov 0   ;;  %v44_v1 = vld [vmem:[#allocation8] sm:$0xff]  ;;  %v119_v15 = vlaneseq }
  0x1a   :  { %42 = vst.msk [vmem:[#allocation3] sm:$0xff] %vm40_vm0, %v298_v0  ;;  %207 = vmatprep.subr.mxu0 %v298_v0  ;;  %209 = vmatprep.mubr.msk.f32.mxu0 %vm299_vm1, %v298_v0  ;;  %v43_v2 = vld [vmem:[#allocation5] sm:$0xff]  ;;  %v300_v3 = vmov -inf   ;;  %vm125_vm2 = vcmask 64512   ;;  %v301_v7 = vmov 0   ;;  %s302_s1 = smov [#allocation10]  }
  0x1b   :  { %208 = vmatpush3.xpose.msra.mxu0 %v44_v1  ;;  %41 = vst.msk [vmem:[#allocation2] sm:$0xff] %vm40_vm0, %v300_v3  ;;  %223 = vset.pattern.permute.xlu0 %v301_v7  ;;  %v120_v16 = vshrl.u32 %v119_v15, 7  ;;  %v122_v17 = vand.u32 127, %v119_v15  ;;  %s195_s19 = sshll.u32 %s302_s1, 4  ;;  %s196_s19 = int_to_ptr.vmem [resolvable:$true] %s195_s19 }
  0x1c   :  { %s270_s22 = scalar_lea.vmem %s196_s19, 128  ;;  %p275_p11 = scmp.lt.s32.totalorder %s196_s19, %s196_s19 }
  0x1d   :  { %vm123_vm3 = vcmp.eq.s32.totalorder %v120_v16, %v122_v17  ;;  %p271_p10 = scmp.ne.s32.totalorder %s196_s19, %s270_s22  ;;  %p276_p12 = scmp.lt.s32.totalorder %s270_s22, %s270_s22 }
  0x1e   :  { %210 = vmatmul.mubr.f32.vlgmr.msra.gmra.mxu0 %v43_v2 }
  0x1f   :  { %p277_p13 = por %p276_p12, %p275_p11 }
  0x21   :  { %v148_v24 = vld [vmem:[#allocation3] sm:$0xff]  ;;  %p278_p0 = pnand %p277_p13, %p271_p10 }
  0x22   :  { %v131_v8 = vld [vmem:[#allocation2] sm:$0xff] }
  0xde   :  { %v111_v4 = vpop.f32.mrf.mxu0 }
  0xdf   :  { %v133_v5 = vsel %vm125_vm2, %v111_v4, -inf  ;;  %v124_v20 = vsel %vm123_vm3, %v111_v4, 0.0 }
  0xe0   :  { %134 = vmax.xlane.f32.xlu0 %v133_v5  ;;  %v211_v6 = vpop.f32.mrf.mxu0  ;;  %v126_v21 = vsel %vm125_vm2, %v124_v20, 0.0 }
 0x169   :  { %v135_v9 = vpop.xlane.xlu0 %134 }
 0x16a   :  { %v136_v10 = vmax.f32 %v131_v8, %v135_v9 }
 0x16c   :  { %v137_v11 = vsub.f32 %v131_v8, %v136_v10  ;;  %156 = vst.msk [vmem:[#allocation2] sm:$0xff] %vm40_vm0, %v136_v10  ;;  %142 = vperm.xlu0 %223, %v136_v10  }
 0x16e   :  { %v138_v22 = vmul.f32 1.442695, %v137_v11 }
 0x173   :  { %v160_v32 = vld [vmem:[#allocation2] sm:$0xff] }
 0x1e7   :  { %v143_v12 = vpop.permute.xlu0 %142 }
 0x1e8   :  { %v145_v13 = vsub.f32 %v111_v4, %v143_v12 }
 0x1ea   :  { %v146_v14 = vmul.f32 1.442695, %v145_v13 }
 0x1ec   :  { %224 = vpow2.f32 %v146_v14 }
 0x1ed   :  { %226 = vpow2.f32 %v138_v22 }
 0x1f9   :  { %v225_v18 = vpop.eup %224 }
 0x1fa   :  { %v150_v19 = vsel %vm125_vm2, %v225_v18, 0.0  ;;  %v227_v23 = vpop.eup %226 }
 0x1fb   :  { %151 = vadd.xlane.f32.xlu1 %v150_v19  ;;  %v149_v25 = vmul.f32 %v227_v23, %v148_v24 }
 0x1ff   :  { %127 = vadd.xlane.f32.xlu1 %v126_v21 }
 0x284   :  { %v152_v26 = vpop.xlane.xlu1 %151 }
 0x285   :  { %v153_v27 = vadd.f32 %v152_v26, %v149_v25 }
 0x287   :  { %155 = vst.msk [vmem:[#allocation3] sm:$0xff] %vm40_vm0, %v153_v27 }
 0x288   :  { %v128_v28 = vpop.xlane.xlu1 %127 }
 0x289   :  { %130 = vst.msk [vmem:[#allocation4] sm:$0xff] %vm40_vm0, %v128_v28 }
 0x28e   :  { %v161_v29 = vld [vmem:[#allocation3] sm:$0xff] }
 0x28f   :  { %228 = vlog2.f32 %v161_v29 }
 0x290   :  { %v175_v35 = vld [vmem:[#allocation4] sm:$0xff] }
 0x291   :  { %v176_v36 = vsel %vm40_vm0, %v175_v35, 0.0 }
 0x29c   :  { %v229_v30 = vpop.eup %228 }
 0x29d   :  { %v163_v31 = vmul.f32 0.6931472, %v229_v30 }
 0x29f   :  { %v164_v33 = vadd.f32 %v163_v31, %v160_v32 }
 0x2a1   :  { %v165_v34 = vsel %vm40_vm0, %v164_v33, 0.0 }
 0x2a2   :  { %166 = vadd.xlane.f32.xlu1 %v165_v34 }
 0x2a6   :  { %177 = vadd.xlane.f32.xlu1 %v176_v36 }
 0x32b   :  { %v167_v37 = vpop.xlane.xlu1 %166 }
 0x32c   :  { %v168_v38 = vrot.slane %v167_v37, 4 }
 0x32e   :  { %v169_v39 = vadd.f32 %v168_v38, %v167_v37 }
 0x32f   :  { %v178_v40 = vpop.xlane.xlu1 %177 }
 0x330   :  { %v170_v41 = vrot.slane %v169_v39, 2  ;;  %v179_v42 = vrot.slane %v178_v40, 4 }
 0x332   :  { %v180_v43 = vadd.f32 %v179_v42, %v178_v40  ;;  %v171_v44 = vadd.f32 %v170_v41, %v169_v39 }
 0x334   :  { %v181_v45 = vrot.slane %v180_v43, 2  ;;  %v172_v46 = vrot.slane %v171_v44, 1 }
 0x336   :  { %v182_v47 = vadd.f32 %v181_v45, %v180_v43  ;;  %v173_v48 = vadd.f32 %v172_v46, %v171_v44 }
 0x338   :  { %212 = vpush %v173_v48  ;;  %v183_v49 = vrot.slane %v182_v47, 1 }
 0x33a   :  { %v184_v50 = vadd.f32 %v183_v49, %v182_v47 }
 0x33c   :  { %214 = vpush %v184_v50 }
 0x369   :  { %s213_s0 = spop %212 }
 0x36d   :  { %s215_s20 = spop %214 }
 0x36e   :  { %s186_s21 = ssub.f32 %s213_s0, %s215_s20 }
 0x370   :  { %v187_v51 = vstv %s186_s21 }
 0x371   :  { %188 = vst [vmem:[#allocation10] sm:$0xff] %v187_v51 }
 0x372   :  { %281 = shalt.err (!%p278_p0)
}
 0x373   :  { %198 = dma.vmem_to_hbm [thread:$0]  %s196_s19, 128, %s339_s2, [#allocation7]  }
 0x374   :  { %294 = dma.done.wait [#allocation7], 128  }
 0x375   :  { %295 = vsyncadd [#allocation7], 4294967168 }
 0x376   :  { %202 = vsyncpa [#allocation6], 1 }
 0x377   :  { %203 = vsyncpa [#allocation9], 1 }
 0x378   :  { %204 = vsyncpa [#allocation7], 1 }

</bundles_post_ra>
